<compile_context>
chip_gen: v7x
topology: tpu7x:2x2x1
jax: 0.10.0
libtpu: 0.0.40
codegen_flags: <defaults>
</compile_context>

<pallas_src>
import math

import numpy as np
import jax
import jax.numpy as jnp
from jax.experimental import pallas as pl
from jax.experimental.pallas import tpu as pltpu

HIDDEN = 32
NUM_HEADS = 8
HEAD_DIM = HIDDEN // NUM_HEADS  # 4


def _round8(x):
    return -(-x // 8) * 8


def _pack_slab(params, L, S, N):
    """Pack weights, biases and all constant 0/1 / bias matrices into one f32 slab."""
    E, H, dh = HIDDEN, NUM_HEADS, HEAD_DIM
    LN, SN = L * N, S * N
    C = H * SN
    scale = 1.0 / math.sqrt(dh)

    p = {k: np.asarray(v, np.float32) for k, v in params.items()}

    off = {}
    off["wq"] = 0                                   # (E, E)   Wq^T * scale
    off["wkv"] = E                                  # (E, 2E)  [Wk^T | Wv^T]
    off["wo"] = 2 * E                               # (E, E)   Wo^T
    off["b"] = 3 * E                                # 3 rows:  bq*scale / [bk|bv] / bo
    off["repl"] = _round8(off["b"] + 3)             # (SN, C)  RepL[j,c] = [c%SN == j]
    off["maskT"] = off["repl"] + _round8(SN)        # (E, C)   [e//dh == c//SN]
    off["neg"] = off["maskT"] + _round8(E)          # (LN, C)  0 / -1e30 cross-batch bias
    off["repr"] = off["neg"] + _round8(LN)          # (C, SN)  RepR = RepL^T
    off["mask2"] = off["repr"] + _round8(C)         # (C, E)   mask2 = maskT^T
    rows = off["mask2"] + _round8(C)
    width = max(C, 2 * E)

    slab = np.zeros((rows, width), np.float32)
    slab[off["wq"]:off["wq"] + E, 0:E] = p["wq"].T * scale
    slab[off["wkv"]:off["wkv"] + E, 0:E] = p["wk"].T
    slab[off["wkv"]:off["wkv"] + E, E:2 * E] = p["wv"].T
    slab[off["wo"]:off["wo"] + E, 0:E] = p["wo"].T
    slab[off["b"] + 0, 0:E] = p["bq"] * scale
    slab[off["b"] + 1, 0:E] = p["bk"]
    slab[off["b"] + 1, E:2 * E] = p["bv"]
    slab[off["b"] + 2, 0:E] = p["bo"]

    j = np.arange(SN)
    c = np.arange(C)
    e = np.arange(E)
    r = np.arange(LN)
    repl = (c[None, :] % SN == j[:, None]).astype(np.float32)            # (SN, C)
    maskT = (e[:, None] // dh == c[None, :] // SN).astype(np.float32)    # (E, C)
    negb = np.where((r[:, None] % N) == (c[None, :] % N), 0.0, -1e30)    # (LN, C)
    slab[off["repl"]:off["repl"] + SN, 0:C] = repl
    slab[off["maskT"]:off["maskT"] + E, 0:C] = maskT
    slab[off["neg"]:off["neg"] + LN, 0:C] = negb.astype(np.float32)
    slab[off["repr"]:off["repr"] + C, 0:SN] = repl.T
    slab[off["mask2"]:off["mask2"] + C, 0:E] = maskT.T
    return slab, off


def _make_kernel(L, S, N, off):
    E = HIDDEN
    LN, SN = L * N, S * N
    C = NUM_HEADS * SN
    f32 = jnp.float32

    def kernel(zq_ref, za_ref, w_ref, o_ref):
        xq = zq_ref[...]                                      # (LN, E)
        xkv = za_ref[...]                                     # (SN, E)

        # Static slices of the single packed slab (all at lane offset 0).
        wq_t = w_ref[off["wq"]:off["wq"] + E, 0:E]            # (E, E)   scale folded
        wkv_t = w_ref[off["wkv"]:off["wkv"] + E, 0:2 * E]     # (E, 2E)
        wo_t = w_ref[off["wo"]:off["wo"] + E, 0:E]            # (E, E)
        bq = w_ref[off["b"] + 0:off["b"] + 1, 0:E]            # (1, E)   scale folded
        bkv = w_ref[off["b"] + 1:off["b"] + 2, 0:2 * E]       # (1, 2E)
        bo = w_ref[off["b"] + 2:off["b"] + 3, 0:E]            # (1, E)
        repl = w_ref[off["repl"]:off["repl"] + SN, 0:C]       # (SN, C)
        maskT = w_ref[off["maskT"]:off["maskT"] + E, 0:C]     # (E, C)
        negb = w_ref[off["neg"]:off["neg"] + LN, 0:C]         # (LN, C)
        reprm = w_ref[off["repr"]:off["repr"] + C, 0:SN]      # (C, SN)
        mask2 = w_ref[off["mask2"]:off["mask2"] + C, 0:E]     # (C, E)

        # Input projections (1/sqrt(dh) already folded into Wq^T / bq).
        q = jnp.dot(xq, wq_t, preferred_element_type=f32) + bq       # (LN, E)
        kv = jnp.dot(xkv, wkv_t, preferred_element_type=f32) + bkv   # (SN, 2E)
        k = kv[:, 0:E]
        v = kv[:, E:2 * E]

        # All-head scores in one lane-dense MXU pass:
        #   KH[e, h*SN+j] = k[j, e] * [e//dh == h], built by MXU replication + mask.
        kh = jnp.dot(k.T, repl, preferred_element_type=f32) * maskT   # (E, C)
        s = jnp.dot(q, kh, preferred_element_type=f32) + negb         # (LN, C)

        # One softmax over the whole (LN, C) slab.  The global row max is a valid
        # stabilizer (constant within each head group of a row); cross-batch entries
        # carry a -1e30 additive bias and exp to exactly 0.
        m = jnp.max(s, axis=-1, keepdims=True)
        p = jnp.exp(s - m)                                            # (LN, C)

        # P @ V with the head concat folded in, plus broadcast per-(row, head)
        # denominators -- both reuse the same 0/1 mask2 constant.
        v2 = jnp.dot(reprm, v, preferred_element_type=f32) * mask2    # (C, E)
        attn_un = jnp.dot(p, v2, preferred_element_type=f32)          # (LN, E)
        denom = jnp.dot(p, mask2, preferred_element_type=f32)         # (LN, E)
        attn = attn_un * pl.reciprocal(denom, approx=False)           # exact for parity

        out = jnp.dot(attn, wo_t, preferred_element_type=f32) + bo    # (LN, E)
        o_ref[...] = out.astype(o_ref.dtype)

    return kernel


def make_attention_fusion(params, L, S, N):
    """Build a jitted forward that closes over the packed parameter/constant slab."""
    E = HIDDEN
    LN, SN = L * N, S * N
    # Single-slab / single-softmax design keeps all heads*keys on the 128 lanes.
    # Larger shapes would need a (8,128)-aligned BlockSpec pipeline instead.
    assert NUM_HEADS * SN <= 128, "re-tile: num_heads * S * N must fit in 128 lanes"

    slab_np, off = _pack_slab(params, L, S, N)
    slab = jnp.asarray(slab_np)                 # built once, closed over (no per-call prep)
    kernel = _make_kernel(L, S, N, off)

    def vmem():
        return pl.BlockSpec(memory_space=pltpu.MemorySpace.VMEM)

    @jax.jit
    def fwd(z, z_a):
        out2 = pl.pallas_call(
            kernel,
            out_shape=jax.ShapeDtypeStruct((LN, E), z.dtype),
            in_specs=[vmem(), vmem(), vmem()],
            out_specs=vmem(),
        )(z.reshape(LN, E), z_a.reshape(SN, E), slab)
        return out2.reshape(L, N, E)

    return fwd


def init_params(key, hidden):
    """Deterministic synthetic init matching nn.MultiheadAttention param shapes."""
    k0, k1, k2 = jax.random.split(key, 3)
    in_proj_w = jax.random.normal(k0, (3 * hidden, hidden), jnp.float32) / math.sqrt(hidden)
    in_proj_b = 0.02 * jax.random.normal(k1, (3 * hidden,), jnp.float32)
    out_w = jax.random.normal(k2, (hidden, hidden), jnp.float32) / math.sqrt(hidden)
    out_b = jnp.zeros((hidden,), jnp.float32)
    return {
        "wq": in_proj_w[:hidden],
        "wk": in_proj_w[hidden:2 * hidden],
        "wv": in_proj_w[2 * hidden:],
        "bq": in_proj_b[:hidden],
        "bk": in_proj_b[hidden:2 * hidden],
        "bv": in_proj_b[2 * hidden:],
        "wo": out_w,
        "bo": out_b,
    }


def mha_reference(z, z_a, p):
    """Pure-JAX reference reproducing nn.MultiheadAttention forward (seq-major)."""
    L, N, E = z.shape
    S = z_a.shape[0]
    H, dh = NUM_HEADS, HEAD_DIM
    q = z @ p["wq"].T + p["bq"]
    k = z_a @ p["wk"].T + p["bk"]
    v = z_a @ p["wv"].T + p["bv"]
    qh = q.reshape(L, N, H, dh)
    kh = k.reshape(S, N, H, dh)
    vh = v.reshape(S, N, H, dh)
    scores = jnp.einsum("lnhd,snhd->nhls", qh, kh) / math.sqrt(dh)
    attn = jax.nn.softmax(scores, axis=-1)
    out = jnp.einsum("nhls,snhd->lnhd", attn, vh).reshape(L, N, E)
    return out @ p["wo"].T + p["bo"]


if __name__ == "__main__":
    L, S, N, E = 8, 8, 2, HIDDEN   # target seq, source seq, batch, hidden
    key = jax.random.PRNGKey(0)
    kz, kza, kp = jax.random.split(key, 3)
    z = jax.random.normal(kz, (L, N, E), jnp.float32)     # video-clip encodings
    z_a = jax.random.normal(kza, (S, N, E), jnp.float32)  # action encodings
    params = init_params(kp, E)

    attention_fusion = make_attention_fusion(params, L, S, N)
    out = jax.block_until_ready(attention_fusion(z, z_a))

    ref = mha_reference(z, z_a, params)
    assert out.shape == (L, N, E)
    assert jnp.allclose(out, ref, rtol=2e-2, atol=2e-2), "mismatch vs reference"

    print("KERNEL_OK")
</pallas_src>

<mosaic_0001>
module attributes {stable_mosaic.version = 11 : i64} {
  func.func @kernel(%arg0: memref<16x32xf32, #tpu.memory_space<vmem>>, %arg1: memref<16x32xf32, #tpu.memory_space<vmem>>, %arg2: memref<424x128xf32, #tpu.memory_space<vmem>>, %arg3: memref<16x32xf32, #tpu.memory_space<vmem>>) attributes {dimension_semantics = [], scalar_prefetch = 0 : i64, scratch_operands = 0 : i64, tpu.core_type = #tpu.core_type<tc>} {
    %c0 = arith.constant 0 : index
    %c0_0 = arith.constant 0 : index
    %0 = vector.load %arg0[%c0, %c0_0] : memref<16x32xf32, #tpu.memory_space<vmem>>, vector<16x32xf32>
    %c0_1 = arith.constant 0 : index
    %c0_2 = arith.constant 0 : index
    %1 = vector.load %arg1[%c0_1, %c0_2] : memref<16x32xf32, #tpu.memory_space<vmem>>, vector<16x32xf32>
    %c0_3 = arith.constant 0 : index
    %c0_4 = arith.constant 0 : index
    %2 = vector.load %arg2[%c0_3, %c0_4] : memref<424x128xf32, #tpu.memory_space<vmem>>, vector<32x32xf32>
    %c32 = arith.constant 32 : index
    %c0_5 = arith.constant 0 : index
    %3 = vector.load %arg2[%c32, %c0_5] : memref<424x128xf32, #tpu.memory_space<vmem>>, vector<32x64xf32>
    %c64 = arith.constant 64 : index
    %c0_6 = arith.constant 0 : index
    %4 = vector.load %arg2[%c64, %c0_6] : memref<424x128xf32, #tpu.memory_space<vmem>>, vector<32x32xf32>
    %c96 = arith.constant 96 : index
    %c0_7 = arith.constant 0 : index
    %5 = vector.load %arg2[%c96, %c0_7] : memref<424x128xf32, #tpu.memory_space<vmem>>, vector<1x32xf32>
    %c97 = arith.constant 97 : index
    %c0_8 = arith.constant 0 : index
    %6 = vector.load %arg2[%c97, %c0_8] : memref<424x128xf32, #tpu.memory_space<vmem>>, vector<1x64xf32>
    %c98 = arith.constant 98 : index
    %c0_9 = arith.constant 0 : index
    %7 = vector.load %arg2[%c98, %c0_9] : memref<424x128xf32, #tpu.memory_space<vmem>>, vector<1x32xf32>
    %c104 = arith.constant 104 : index
    %c0_10 = arith.constant 0 : index
    %8 = vector.load %arg2[%c104, %c0_10] : memref<424x128xf32, #tpu.memory_space<vmem>>, vector<16x128xf32>
    %c120 = arith.constant 120 : index
    %c0_11 = arith.constant 0 : index
    %9 = vector.load %arg2[%c120, %c0_11] : memref<424x128xf32, #tpu.memory_space<vmem>>, vector<32x128xf32>
    %c152 = arith.constant 152 : index
    %c0_12 = arith.constant 0 : index
    %10 = vector.load %arg2[%c152, %c0_12] : memref<424x128xf32, #tpu.memory_space<vmem>>, vector<16x128xf32>
    %c168 = arith.constant 168 : index
    %c0_13 = arith.constant 0 : index
    %11 = vector.load %arg2[%c168, %c0_13] : memref<424x128xf32, #tpu.memory_space<vmem>>, vector<128x16xf32>
    %c296 = arith.constant 296 : index
    %c0_14 = arith.constant 0 : index
    %12 = vector.load %arg2[%c296, %c0_14] : memref<424x128xf32, #tpu.memory_space<vmem>>, vector<128x32xf32>
    %cst = arith.constant dense<0.000000e+00> : vector<16x32xf32>
    %13 = tpu.matmul %0, %2, %cst {dimension_numbers = #tpu.dot_dimension_numbers<[1], [0], [0], [1], [0, 0, 1, 1], [], []>} : vector<16x32xf32>, vector<32x32xf32>, vector<16x32xf32> -> vector<16x32xf32>
    %14 = vector.broadcast %5 : vector<1x32xf32> to vector<16x32xf32>
    %15 = arith.addf %13, %14 : vector<16x32xf32>
    %cst_15 = arith.constant dense<0.000000e+00> : vector<16x64xf32>
    %16 = tpu.matmul %1, %3, %cst_15 {dimension_numbers = #tpu.dot_dimension_numbers<[1], [0], [0], [1], [0, 0, 1, 1], [], []>} : vector<16x32xf32>, vector<32x64xf32>, vector<16x64xf32> -> vector<16x64xf32>
    %17 = vector.broadcast %6 : vector<1x64xf32> to vector<16x64xf32>
    %18 = arith.addf %16, %17 : vector<16x64xf32>
    %19 = vector.extract_strided_slice %18 {offsets = [0, 0], sizes = [16, 32], strides = [1, 1]} : vector<16x64xf32> to vector<16x32xf32>
    %20 = vector.extract_strided_slice %18 {offsets = [0, 32], sizes = [16, 32], strides = [1, 1]} : vector<16x64xf32> to vector<16x32xf32>
    %21 = tpu.transpose %19, [1, 0] : vector<16x32xf32> -> vector<32x16xf32>
    %cst_16 = arith.constant dense<0.000000e+00> : vector<32x128xf32>
    %22 = tpu.matmul %21, %8, %cst_16 {dimension_numbers = #tpu.dot_dimension_numbers<[1], [0], [0], [1], [0, 0, 1, 1], [], []>} : vector<32x16xf32>, vector<16x128xf32>, vector<32x128xf32> -> vector<32x128xf32>
    %23 = arith.mulf %22, %9 : vector<32x128xf32>
    %cst_17 = arith.constant dense<0.000000e+00> : vector<16x128xf32>
    %24 = tpu.matmul %15, %23, %cst_17 {dimension_numbers = #tpu.dot_dimension_numbers<[1], [0], [0], [1], [0, 0, 1, 1], [], []>} : vector<16x32xf32>, vector<32x128xf32>, vector<16x128xf32> -> vector<16x128xf32>
    %25 = arith.addf %24, %10 : vector<16x128xf32>
    %cst_18 = arith.constant dense<0xFF800000> : vector<16xf32>
    %26 = vector.multi_reduction <maximumf>, %25, %cst_18 [1] : vector<16x128xf32> to vector<16xf32>
    %27 = vector.shape_cast %26 : vector<16xf32> to vector<16x1xf32>
    %28 = vector.broadcast %27 : vector<16x1xf32> to vector<16x128xf32>
    %29 = arith.subf %25, %28 : vector<16x128xf32>
    %30 = math.exp %29 : vector<16x128xf32>
    %cst_19 = arith.constant dense<0.000000e+00> : vector<128x32xf32>
    %31 = tpu.matmul %11, %20, %cst_19 {dimension_numbers = #tpu.dot_dimension_numbers<[1], [0], [0], [1], [0, 0, 1, 1], [], []>} : vector<128x16xf32>, vector<16x32xf32>, vector<128x32xf32> -> vector<128x32xf32>
    %32 = arith.mulf %31, %12 : vector<128x32xf32>
    %cst_20 = arith.constant dense<0.000000e+00> : vector<16x32xf32>
    %33 = tpu.matmul %30, %32, %cst_20 {dimension_numbers = #tpu.dot_dimension_numbers<[1], [0], [0], [1], [0, 0, 1, 1], [], []>} : vector<16x128xf32>, vector<128x32xf32>, vector<16x32xf32> -> vector<16x32xf32>
    %cst_21 = arith.constant dense<0.000000e+00> : vector<16x32xf32>
    %34 = tpu.matmul %30, %12, %cst_21 {dimension_numbers = #tpu.dot_dimension_numbers<[1], [0], [0], [1], [0, 0, 1, 1], [], []>} : vector<16x128xf32>, vector<128x32xf32>, vector<16x32xf32> -> vector<16x32xf32>
    %35 = tpu.reciprocal %34 : vector<16x32xf32> -> vector<16x32xf32>
    %36 = arith.mulf %33, %35 : vector<16x32xf32>
    %cst_22 = arith.constant dense<0.000000e+00> : vector<16x32xf32>
    %37 = tpu.matmul %36, %4, %cst_22 {dimension_numbers = #tpu.dot_dimension_numbers<[1], [0], [0], [1], [0, 0, 1, 1], [], []>} : vector<16x32xf32>, vector<32x32xf32>, vector<16x32xf32> -> vector<16x32xf32>
    %38 = vector.broadcast %7 : vector<1x32xf32> to vector<16x32xf32>
    %39 = arith.addf %37, %38 : vector<16x32xf32>
    %c0_23 = arith.constant 0 : index
    %c0_24 = arith.constant 0 : index
    %40 = vector.load %arg3[%c0_23, %c0_24] : memref<16x32xf32, #tpu.memory_space<vmem>>, vector<16x32xf32>
    tpu.vector_store %arg3[%c0_23, %c0_24], %39 {strides = array<i32>} : memref<16x32xf32, #tpu.memory_space<vmem>>, vector<16x32xf32>,
    return
  }
}

</mosaic_0001>

<bundles_post_ra>
// kernel: fwd.1
= control target key start
LH: loop header
LB: loop body
LE: loop exit
PB: predicated region body
PF: predicated region fallthrough
CT: control target
= control target key end

     0   :  { %8 = vsyncpa [#allocation3], 0  ;;  %s1597_s0 = inlined_call_operand.hbm [shape: f32[16,32], index: 0, kind: input, shape index: {}]   ;;  %s1598_s1 = inlined_call_operand.hbm [shape: f32[16,32], index: 1, kind: input, shape index: {}]   ;;  %s1599_s2 = inlined_call_operand.hbm [shape: f32[424,128], index: 2, kind: input, shape index: {}]   ;;  %s1600_s3 = inlined_call_operand.hbm [shape: f32[16,32], index: 3, kind: output, shape index: {}]  }
   0x1   :  { %9 = vsyncpa [#allocation6], 0 }
   0x2   :  { %10 = vsyncpa [#allocation4], 0  ;;  %s1473_s12 = smov [#allocation5]   ;;  %s1474_s14 = smov [#allocation2]  }
   0x3   :  { %s28_s13 = sshll.u32 %s1473_s12, 4  ;;  %s16_s15 = sshll.u32 %s1474_s14, 4  ;;  %s29_s13 = int_to_ptr.vmem [resolvable:$true] %s28_s13  ;;  %s1500_s15 = int_to_ptr.vmem [resolvable:$true] %s16_s15 }
   0x4   :  { %s1379_s18 = scalar_lea.hbm %s1598_s1, 256 }
   0x5   :  { %p1380_p0 = scmp.ne.s32.totalorder %s1598_s1, %s1379_s18  ;;  %p1383_p1 = scmp.lt.u32.totalorder %s1379_s18, %s1598_s1 }
   0x7   :  { %p1385_p2 = pnand %p1383_p1, %p1380_p0 }
   0x9   :  { %1388 = shalt.err (!%p1385_p2)
}
   0xa   :  { %s1389_s23 = scalar_lea.vmem %s29_s13, 256  ;;  %p1394_p4 = scmp.lt.s32.totalorder %s29_s13, %s29_s13 }
   0xb   :  { %p1390_p3 = scmp.ne.s32.totalorder %s29_s13, %s1389_s23  ;;  %p1395_p5 = scmp.lt.s32.totalorder %s1389_s23, %s1389_s23 }
   0xd   :  { %p1396_p6 = por %p1395_p5, %p1394_p4 }
   0xf   :  { %p1397_p7 = pnand %p1396_p6, %p1390_p3 }
  0x11   :  { %1400 = shalt.err (!%p1397_p7)
}
  0x12   :  { %s1475_s24 = smov 128   ;;  %s1476_s25 = smov 8  }
  0x13   :  { %34 = dma.hbm_to_vmem [thread:$0]  %s1598_s1, 256, %s29_s13, [#allocation6], %s1475_s24, %s1475_s24, %s1476_s25  }
  0x14   :  { %s1401_s30 = scalar_lea.hbm %s1597_s0, 256 }
  0x15   :  { %p1402_p8 = scmp.ne.s32.totalorder %s1597_s0, %s1401_s30  ;;  %p1405_p9 = scmp.lt.u32.totalorder %s1401_s30, %s1597_s0 }
  0x17   :  { %p1407_p10 = pnand %p1405_p9, %p1402_p8 }
  0x19   :  { %1410 = shalt.err (!%p1407_p10)
}
  0x1a   :  { %s1411_s8 = scalar_lea.vmem %s1500_s15, 256  ;;  %p1416_p12 = scmp.lt.s32.totalorder %s1500_s15, %s1500_s15 }
  0x1b   :  { %p1412_p11 = scmp.ne.s32.totalorder %s1500_s15, %s1411_s8  ;;  %p1417_p13 = scmp.lt.s32.totalorder %s1411_s8, %s1411_s8 }
  0x1d   :  { %p1418_p0 = por %p1417_p13, %p1416_p12 }
  0x1f   :  { %p1419_p1 = pnand %p1418_p0, %p1412_p11 }
  0x21   :  { %1422 = shalt.err (!%p1419_p1)
}
  0x22   :  { %22 = dma.hbm_to_vmem [thread:$0]  %s1597_s0, 256, %s1500_s15, [#allocation3], %s1475_s24, %s1475_s24, %s1476_s25  }
  0x23   :  { %s1477_s10 = smov [#allocation7]   ;;  %s1423_s14 = scalar_lea.hbm %s1599_s2, 6784 }
  0x24   :  { %s40_s11 = sshll.u32 %s1477_s10, 4  ;;  %p1424_p2 = scmp.ne.s32.totalorder %s1599_s2, %s1423_s14  ;;  %s41_s11 = int_to_ptr.vmem [resolvable:$true] %s40_s11 }
  0x25   :  { %p1427_p3 = scmp.lt.u32.totalorder %s1423_s14, %s1599_s2 }
  0x27   :  { %p1429_p4 = pnand %p1427_p3, %p1424_p2 }
  0x29   :  { %1432 = shalt.err (!%p1429_p4)
}
  0x2a   :  { %s1433_s20 = scalar_lea.vmem %s41_s11, 6784  ;;  %p1438_p6 = scmp.lt.s32.totalorder %s41_s11, %s41_s11 }
  0x2b   :  { %p1434_p5 = scmp.ne.s32.totalorder %s41_s11, %s1433_s20  ;;  %p1439_p7 = scmp.lt.s32.totalorder %s1433_s20, %s1433_s20 }
  0x2d   :  { %p1440_p8 = por %p1439_p7, %p1438_p6 }
  0x2f   :  { %p1441_p9 = pnand %p1440_p8, %p1434_p5 }
  0x31   :  { %1444 = shalt.err (!%p1441_p9)
}
  0x32   :  { %46 = dma.hbm_to_vmem [thread:$0]  %s1599_s2, 6784, %s41_s11, [#allocation6], %s1475_s24, %s1475_s24, %s1476_s25  }
  0x33   :  { %1467 = dma.done.wait [#allocation3], 256  }
  0x34   :  { %1468 = vsyncadd [#allocation3], 4294967040 }
  0x35   :  { %1469 = dma.done.wait [#allocation6], 7040  }
  0x36   :  { %1470 = vsyncadd [#allocation6], 4294960256  ;;  %vm119_vm0 = vcmask 261120   ;;  %v64_v0 = vld [vmem:[#allocation7 + $0x20] sm:$0xff]  ;;  %v65_v1 = vld [vmem:[#allocation7 + $0x28] sm:$0xff]  ;;  %s1478_s2 = smov 96  }
  0x37   :  { %v66_v2 = vld [vmem:[#allocation7 + $0x30] sm:$0xff]  ;;  %v1262_v3 = vpack.c.bf16 %v65_v1, %v64_v0  ;;  %v67_v4 = vld [vmem:[#allocation7 + $0x38] sm:$0xff]  ;;  %v60_v8 = vld [vmem:[#allocation7] sm:$0xff]  ;;  %vm318_vm1 = vcmask 130048   ;;  %s1479_s21 = smov [#allocation8]  }
  0x38   :  { %v58_v5 = vld [vmem:[#allocation5] sm:$0xff]  ;;  %v1266_v6 = vpack.c.bf16 %v67_v4, %v66_v2  ;;  %v59_v7 = vld [vmem:[#allocation5 + $0x8] sm:$0xff]  ;;  %v61_v9 = vld [vmem:[#allocation7 + $0x8] sm:$0xff]  ;;  %s974_s22 = sshll.u32 %s1479_s21, 4  ;;  %s975_s22 = int_to_ptr.vmem [resolvable:$true] %s974_s22 }
  0x39   :  { %1121 = vmatprep.mubr.msk.f32.mxu1 %vm119_vm0, %v58_v5  ;;  %1263 = vmatprep.subr.bf16.mxu1 %v1262_v3  ;;  %v62_v10 = vld [vmem:[#allocation7 + $0x10] sm:$0xff]  ;;  %v1254_v11 = vpack.c.bf16 %v61_v9, %v60_v8  ;;  %v63_v12 = vld [vmem:[#allocation7 + $0x18] sm:$0xff]  ;;  %v75_v14 = vld [vmem:[#allocation7 + $0x68] sm:$0xff]  ;;  %s1445_s23 = scalar_lea.vmem %s975_s22, 256  ;;  %p1450_p11 = scmp.lt.s32.totalorder %s975_s22, %s975_s22 }
  0x3a   :  { %1265 = vmatpush3.bf16.msra.mxu1 %v1262_v3  ;;  %v1258_v13 = vpack.c.bf16 %v63_v12, %v62_v10  ;;  %v76_v15 = vld [vmem:[#allocation7 + $0x70] sm:$0xff]  ;;  %v56_v17 = vld [vmem:[#allocation2] sm:$0xff]  ;;  %v57_v18 = vld [vmem:[#allocation2 + $0x8] sm:$0xff]  ;;  %p1446_p10 = scmp.ne.s32.totalorder %s975_s22, %s1445_s23  ;;  %p1451_p12 = scmp.lt.s32.totalorder %s1445_s23, %s1445_s23 }
  0x3b   :  { %1267 = vmatprep.subr.bf16.mxu1 %v1266_v6  ;;  %1255 = vmatprep.subr.bf16.mxu0 %v1254_v11  ;;  %v1270_v16 = vpack.c.bf16 %v76_v15, %v75_v14  ;;  %v990_v19 = vld [vmem:[#allocation7 + $0x61] ss:$0 sm:$0xff]  ;;  %v987_v33 = vld [vmem:[#allocation7 + $0x60] ss:$0 sm:$0xff]  ;;  %v83_v38 = vld [vmem:[#allocation7 + $0xa8] sm:$0xff] }
  0x3c   :  { %1257 = vmatpush3.bf16.msra.mxu0 %v1254_v11  ;;  %1110 = vmatprep.mubr.msk.f32.mxu0 %vm119_vm0, %v56_v17  ;;  %v84_v39 = vld [vmem:[#allocation7 + $0xb0] sm:$0xff]  ;;  %v85_v40 = vld [vmem:[#allocation7 + $0xb8] sm:$0xff]  ;;  %v86_v41 = vld [vmem:[#allocation7 + $0xc0] sm:$0xff]  ;;  %p1452_p13 = por %p1451_p12, %p1450_p11 }
  0x3d   :  { %1259 = vmatprep.subr.bf16.mxu0 %v1258_v13  ;;  %v87_v42 = vld [vmem:[#allocation7 + $0xc8] sm:$0xff]  ;;  %v88_v43 = vld [vmem:[#allocation7 + $0xd0] sm:$0xff]  ;;  %v89_v44 = vld [vmem:[#allocation7 + $0xd8] sm:$0xff] }
  0x3e   :  { %1269 = vmatpush3.bf16.msra.mxu1 %v1266_v6  ;;  %v90_v45 = vld [vmem:[#allocation7 + $0xe0] sm:$0xff]  ;;  %v91_v46 = vld [vmem:[#allocation7 + $0xe8] sm:$0xff]  ;;  %v92_v47 = vld [vmem:[#allocation7 + $0xf0] sm:$0xff]  ;;  %p1453_p0 = pnand %p1452_p13, %p1446_p10 }
  0x3f   :  { %v93_v48 = vld [vmem:[#allocation7 + $0xf8] sm:$0xff]  ;;  %v94_v49 = vld [vmem:[#allocation7 + $0x100] sm:$0xff]  ;;  %v95_v50 = vld [vmem:[#allocation7 + $0x108] sm:$0xff] }
  0x40   :  { %1261 = vmatpush3.bf16.msra.mxu0 %v1258_v13  ;;  %v96_v51 = vld [vmem:[#allocation7 + $0x110] sm:$0xff]  ;;  %v97_v52 = vld [vmem:[#allocation7 + $0x118] sm:$0xff]  ;;  %v98_v53 = vld [vmem:[#allocation7 + $0x120] sm:$0xff] }
  0x41   :  { %1122 = vmatmul.mubr.msk.f32.vlgmr.msra.gmra.mrb[0].mxu1 %vm119_vm0, %v59_v7  ;;  %1271 = vmatprep.subr.bf16.mxu0 %v1270_v16  ;;  %v78_v54 = vld [vmem:[#allocation7 + $0x80] sm:$0xff]  ;;  %v77_v55 = vld [vmem:[#allocation7 + $0x78] sm:$0xff]  ;;  %v80_v61 = vld [vmem:[#allocation7 + $0x90] sm:$0xff] }
  0x42   :  { %v79_v62 = vld [vmem:[#allocation7 + $0x88] sm:$0xff]  ;;  %v100_v4 = vld [vmem:[#allocation7 + $0x130] sm:$0xff]  ;;  %v102_v7 = vld [vmem:[#allocation7 + $0x140] sm:$0xff] }
  0x43   :  { %1111 = vmatmul.mubr.msk.f32.vlgmr.msra.gmra.mrb[0].mxu0 %vm119_vm0, %v57_v18  ;;  %v99_v6 = vld [vmem:[#allocation7 + $0x128] sm:$0xff]  ;;  %v101_v11 = vld [vmem:[#allocation7 + $0x138] sm:$0xff] }
  0x44   :  { %1273 = vmatpush3.bf16.msra.mxu0 %v1270_v16  ;;  %v1318_v10 = vpack.c.bf16 %v100_v4, %v99_v6  ;;  %v1322_v14 = vpack.c.bf16 %v102_v7, %v101_v11 }
 0x114   :  { %v1123_v20 = vpop.f32.mrb[0].mxu1 }
 0x115   :  { %v283_v21 = vadd.f32 %v1123_v20, %v990_v19  ;;  %v277_v22 = vpop.f32.mrb[1].mxu1  ;;  %v103_v20 = vld [vmem:[#allocation7 + $0x148] sm:$0xff] }
 0x116   :  { %v278_v23 = vadd.f32 %v990_v19, %v277_v22  ;;  %v1112_v34 = vpop.f32.mrb[0].mxu0  ;;  %v104_v19 = vld [vmem:[#allocation7 + $0x150] sm:$0xff] }
 0x117   :  { %v198_v35 = vadd.f32 %v1112_v34, %v987_v33  ;;  %v192_v36 = vpop.f32.mrb[1].mxu0 }
 0x118   :  { %286 = vxpose.xlu0.b32.start [1/2] (short) (narrow) %v278_v23, 32  ;;  %v1366_v24 = vpack.i.bf16 %v283_v21, %v278_v23  ;;  %v193_v37 = vadd.f32 %v987_v33, %v192_v36  ;;  %v107_v36 = vld [vmem:[#allocation7 + $0x168] sm:$0xff] }
 0x11a   :  { %1367 = vrot.lane.b32.xlu1 %v1366_v24, %s1478_s2  ;;  %1142 = vmatprep.mubr.msk.f32.mxu1 %vm119_vm0, %v193_v37 }
 0x11c   :  { %287 = vxpose.xlu0.b32.end [2/2] (short) (narrow) %v283_v21, 32  ;;  %v1326_v21 = vpack.c.bf16 %v104_v19, %v103_v20 }
 0x18c   :  { %v1368_v25 = vpop.permute.xlu1 %1367 }
 0x18d   :  { %v1370_v26 = vunpack.i.h.bf16 %v1368_v25  ;;  %v1369_v27 = vunpack.i.l.bf16 %v1368_v25 }
 0x18f   :  { %v1282_v28 = vpack.c.bf16 %v1370_v26, %v1369_v27  ;;  %v106_v27 = vld [vmem:[#allocation7 + $0x160] sm:$0xff] }
 0x191   :  { %1283 = vmatprep.subr.bf16.mxu0 %v1282_v28 }
 0x198   :  { %v302_v29 = vpop.trf.xlu0 }
 0x199   :  { %1128 = vmatprep.mubr.msk.f32.mxu0 %vm318_vm1, %v302_v29 }
 0x19c   :  { %v303_v30 = vpop.trf.xlu0 }
 0x19d   :  { %1129 = vmatmul.mubr.msk.f32.vlgmr.msra.gmra.mrb[2].mxu0 %vm318_vm1, %v303_v30 }
 0x19e   :  { %1285 = vmatpush3.bf16.msra.mxu0 %v1282_v28  ;;  %v105_v28 = vld [vmem:[#allocation7 + $0x158] sm:$0xff] }
 0x19f   :  { %1319 = vmatprep.subr.bf16.mxu0 %v1318_v10  ;;  %v1330_v29 = vpack.c.bf16 %v106_v27, %v105_v28 }
 0x1a0   :  { %v304_v31 = vpop.trf.xlu0 }
 0x1a1   :  { %1131 = vmatprep.mubr.msk.f32.mxu0 %vm318_vm1, %v304_v31 }
 0x1a4   :  { %v305_v32 = vpop.trf.xlu0 }
 0x1a5   :  { %1132 = vmatmul.mubr.msk.f32.gmra.mrb[4].mxu0 %vm318_vm1, %v305_v32 }
 0x1a6   :  { %1149 = vmatprep.mubr.msk.f32.mxu0 %vm318_vm1, %v83_v38 }
 0x1a9   :  { %1150 = vmatmul.mubr.msk.f32.vlgmr.msra.gmra.mrb[6].mxu0 %vm318_vm1, %v84_v39 }
 0x1aa   :  { %1152 = vmatprep.mubr.msk.f32.mxu0 %vm318_vm1, %v85_v40  ;;  %1321 = vmatpush3.bf16.msra.mxu0 %v1318_v10 }
 0x1ab   :  { %1323 = vmatprep.subr.bf16.mxu0 %v1322_v14 }
 0x1ad   :  { %1153 = vmatmul.mubr.msk.f32.gmra.mrb[8].mxu0 %vm318_vm1, %v86_v41 }
 0x1ae   :  { %1155 = vmatprep.mubr.msk.f32.mxu0 %vm318_vm1, %v87_v42  ;;  %1325 = vmatpush3.bf16.msra.mxu0 %v1322_v14 }
 0x1af   :  { %1327 = vmatprep.subr.bf16.mxu0 %v1326_v21 }
 0x1b1   :  { %1156 = vmatmul.mubr.msk.f32.gmra.mrb[10].mxu0 %vm318_vm1, %v88_v43 }
 0x1b2   :  { %1158 = vmatprep.mubr.msk.f32.mxu0 %vm318_vm1, %v89_v44  ;;  %1329 = vmatpush3.bf16.msra.mxu0 %v1326_v21  ;;  %v70_v21 = vld [vmem:[#allocation7 + $0x50] sm:$0xff] }
 0x1b3   :  { %1331 = vmatprep.subr.bf16.mxu0 %v1330_v29 }
 0x1b5   :  { %1159 = vmatmul.mubr.msk.f32.gmra.mrb[12].mxu0 %vm318_vm1, %v90_v45  ;;  %v82_v45 = vld [vmem:[#allocation7 + $0xa0] sm:$0xff] }
 0x1b6   :  { %1161 = vmatprep.mubr.msk.f32.mxu0 %vm318_vm1, %v91_v46  ;;  %1333 = vmatpush3.bf16.msra.mxu0 %v1330_v29  ;;  %v81_v46 = vld [vmem:[#allocation7 + $0x98] sm:$0xff] }
 0x1b9   :  { %1162 = vmatmul.mubr.msk.f32.gmra.mrb[14].mxu0 %vm318_vm1, %v92_v47 }
 0x1ba   :  { %1164 = vmatprep.mubr.msk.f32.mxu0 %vm318_vm1, %v93_v48 }
 0x1bd   :  { %1165 = vmatmul.mubr.msk.f32.gmra.mrb[16].mxu0 %vm318_vm1, %v94_v49 }
 0x1be   :  { %1167 = vmatprep.mubr.msk.f32.mxu0 %vm318_vm1, %v95_v50 }
 0x1c1   :  { %1168 = vmatmul.mubr.msk.f32.gmra.mrb[18].mxu0 %vm318_vm1, %v96_v51  ;;  %v110_v51 = vld [vmem:[#allocation7 + $0x180] sm:$0xff] }
 0x1c2   :  { %1170 = vmatprep.mubr.msk.f32.mxu0 %vm318_vm1, %v97_v52 }
 0x1c5   :  { %1171 = vmatmul.mubr.msk.f32.gmra.mrb[20].mxu0 %vm318_vm1, %v98_v53  ;;  %v109_v53 = vld [vmem:[#allocation7 + $0x178] sm:$0xff] }
 0x270   :  { %v1130_v56 = vpop.f32.mrb[2].mxu0 }
 0x271   :  { %v417_v57 = vmul.f32 %v1130_v56, %v78_v54  ;;  %v397_v58 = vpop.f32.mrb[3].mxu0 }
 0x272   :  { %v416_v59 = vmul.f32 %v397_v58, %v77_v55 }
 0x274   :  { %v1274_v60 = vpack.c.bf16 %v417_v57, %v416_v59  ;;  %v1338_v57 = vpack.c.bf16 %v110_v51, %v109_v53  ;;  %v112_v59 = vld [vmem:[#allocation7 + $0x190] sm:$0xff] }
 0x276   :  { %1275 = vmatprep.subr.bf16.mxu1 %v1274_v60 }
 0x277   :  { %1277 = vmatpush3.bf16.msra.mxu1 %v1274_v60  ;;  %v111_v60 = vld [vmem:[#allocation7 + $0x188] sm:$0xff] }
 0x278   :  { %v1133_v63 = vpop.f32.mrb[4].mxu0 }
 0x279   :  { %v419_v0 = vmul.f32 %v1133_v63, %v80_v61  ;;  %v407_v1 = vpop.f32.mrb[5].mxu0 }
 0x27a   :  { %v418_v2 = vmul.f32 %v407_v1, %v79_v62  ;;  %v114_v62 = vld [vmem:[#allocation7 + $0x1a0] sm:$0xff]  ;;  %v1342_v1 = vpack.c.bf16 %v112_v59, %v111_v60 }
 0x27c   :  { %v1278_v3 = vpack.c.bf16 %v419_v0, %v418_v2  ;;  %v1151_v5 = vpop.f32.mrb[6].mxu0 }
 0x27d   :  { %v713_v8 = vmul.f32 %v1151_v5, %v100_v4  ;;  %v633_v9 = vpop.f32.mrb[7].mxu0 }
 0x27e   :  { %1279 = vmatprep.subr.bf16.mxu1 %v1278_v3  ;;  %v712_v12 = vmul.f32 %v633_v9, %v99_v6 }
 0x27f   :  { %1281 = vmatpush3.bf16.msra.mxu1 %v1278_v3  ;;  %v113_v3 = vld [vmem:[#allocation7 + $0x198] sm:$0xff] }
 0x280   :  { %v1154_v13 = vpop.f32.mrb[8].mxu0  ;;  %v1286_v17 = vpack.c.bf16 %v713_v8, %v712_v12  ;;  %v1346_v8 = vpack.c.bf16 %v114_v62, %v113_v3 }
 0x281   :  { %v715_v15 = vmul.f32 %v1154_v13, %v102_v7  ;;  %v643_v16 = vpop.f32.mrb[9].mxu0 }
 0x282   :  { %1143 = vmatmul.mubr.msk.f32.vlgmr.msra.gmra.mrb[2].mxu1 %vm119_vm0, %v198_v35  ;;  %v714_v18 = vmul.f32 %v643_v16, %v101_v11  ;;  %1287 = vmatprep.subr.bf16.mxu1 %v1286_v17  ;;  %v108_v35 = vld [vmem:[#allocation7 + $0x170] sm:$0xff] }
 0x283   :  { %1289 = vmatpush3.bf16.msra.mxu1 %v1286_v17  ;;  %v1334_v37 = vpack.c.bf16 %v108_v35, %v107_v36 }
 0x284   :  { %v1290_v22 = vpack.c.bf16 %v715_v15, %v714_v18  ;;  %v1157_v23 = vpop.f32.mrb[10].mxu0  ;;  %v68_v18 = vld [vmem:[#allocation7 + $0x40] sm:$0xff] }
 0x285   :  { %v717_v24 = vmul.f32 %v1157_v23, %v104_v19  ;;  %v653_v25 = vpop.f32.mrb[11].mxu0  ;;  %1335 = vmatprep.subr.bf16.mxu0 %v1334_v37  ;;  %v69_v19 = vld [vmem:[#allocation7 + $0x48] sm:$0xff] }
 0x286   :  { %v716_v26 = vmul.f32 %v653_v25, %v103_v20  ;;  %1291 = vmatprep.subr.bf16.mxu1 %v1290_v22  ;;  %1337 = vmatpush3.bf16.msra.mxu0 %v1334_v37  ;;  %v1350_v20 = vpack.c.bf16 %v69_v19, %v68_v18 }
 0x287   :  { %1293 = vmatpush3.bf16.msra.mxu1 %v1290_v22  ;;  %1339 = vmatprep.subr.bf16.mxu0 %v1338_v57  ;;  %v71_v22 = vld [vmem:[#allocation7 + $0x58] sm:$0xff] }
 0x288   :  { %v1294_v30 = vpack.c.bf16 %v717_v24, %v716_v26  ;;  %v1160_v31 = vpop.f32.mrb[12].mxu0  ;;  %v1354_v23 = vpack.c.bf16 %v71_v22, %v70_v21 }
 0x289   :  { %v719_v32 = vmul.f32 %v1160_v31, %v106_v27  ;;  %v663_v33 = vpop.f32.mrb[13].mxu0 }
 0x28a   :  { %v718_v34 = vmul.f32 %v663_v33, %v105_v28  ;;  %1295 = vmatprep.subr.bf16.mxu1 %v1294_v30  ;;  %1341 = vmatpush3.bf16.msra.mxu0 %v1338_v57 }
 0x28b   :  { %1297 = vmatpush3.bf16.msra.mxu1 %v1294_v30  ;;  %1343 = vmatprep.subr.bf16.mxu0 %v1342_v1 }
 0x28c   :  { %v1298_v38 = vpack.c.bf16 %v719_v32, %v718_v34  ;;  %v1163_v39 = vpop.f32.mrb[14].mxu0  ;;  %v1015_v32 = vld [vmem:[#allocation7 + $0x62] ss:$0 sm:$0xff] }
 0x28d   :  { %v721_v40 = vmul.f32 %v1163_v39, %v108_v35  ;;  %v673_v41 = vpop.f32.mrb[15].mxu0 }
 0x28e   :  { %v720_v42 = vmul.f32 %v673_v41, %v107_v36  ;;  %1299 = vmatprep.subr.bf16.mxu1 %v1298_v38  ;;  %1345 = vmatpush3.bf16.msra.mxu0 %v1342_v1 }
 0x28f   :  { %1301 = vmatpush3.bf16.msra.mxu1 %v1298_v38  ;;  %1347 = vmatprep.subr.bf16.mxu0 %v1346_v8 }
 0x290   :  { %v1302_v43 = vpack.c.bf16 %v721_v40, %v720_v42  ;;  %v1166_v44 = vpop.f32.mrb[16].mxu0 }
 0x291   :  { %v723_v52 = vmul.f32 %v1166_v44, %v110_v51  ;;  %v683_v54 = vpop.f32.mrb[17].mxu0 }
 0x292   :  { %1303 = vmatprep.subr.bf16.mxu1 %v1302_v43  ;;  %v722_v55 = vmul.f32 %v683_v54, %v109_v53  ;;  %1349 = vmatpush3.bf16.msra.mxu0 %v1346_v8 }
 0x293   :  { %1305 = vmatpush3.bf16.msra.mxu1 %v1302_v43 }
 0x294   :  { %v1306_v56 = vpack.c.bf16 %v723_v52, %v722_v55  ;;  %v1169_v58 = vpop.f32.mrb[18].mxu0 }
 0x295   :  { %v693_v61 = vpop.f32.mrb[19].mxu0  ;;  %v725_v63 = vmul.f32 %v1169_v58, %v112_v59 }
 0x296   :  { %v724_v0 = vmul.f32 %v693_v61, %v111_v60  ;;  %1307 = vmatprep.subr.bf16.mxu1 %v1306_v56 }
 0x297   :  { %1309 = vmatpush3.bf16.msra.mxu1 %v1306_v56 }
 0x298   :  { %v1172_v2 = vpop.f32.mrb[20].mxu0  ;;  %v1310_v6 = vpack.c.bf16 %v725_v63, %v724_v0 }
 0x299   :  { %v727_v4 = vmul.f32 %v1172_v2, %v114_v62  ;;  %v703_v5 = vpop.f32.mrb[21].mxu0 }
 0x29a   :  { %v726_v7 = vmul.f32 %v703_v5, %v113_v3  ;;  %1311 = vmatprep.subr.bf16.mxu1 %v1310_v6 }
 0x29b   :  { %1313 = vmatpush3.bf16.msra.mxu1 %v1310_v6 }
 0x29c   :  { %v1314_v9 = vpack.c.bf16 %v727_v4, %v726_v7 }
 0x29e   :  { %1315 = vmatprep.subr.bf16.mxu1 %v1314_v9 }
 0x29f   :  { %1317 = vmatpush3.bf16.msra.mxu1 %v1314_v9 }
 0x2a0   :  { %1351 = vmatprep.subr.bf16.mxu1 %v1350_v20 }
 0x355   :  { %v1144_v47 = vpop.f32.mrb[2].mxu1 }
 0x356   :  { %v498_v48 = vadd.f32 %v1144_v47, %v82_v45  ;;  %v492_v49 = vpop.f32.mrb[3].mxu1 }
 0x357   :  { %v493_v50 = vadd.f32 %v492_v49, %v81_v46 }
 0x358   :  { %503 = vmax.xlane.f32.xlu0 %v498_v48 }
 0x359   :  { %501 = vmax.xlane.f32.xlu1 %v493_v50 }
 0x3e5   :  { %v504_v10 = vpop.xlane.xlu0 %503 }
 0x3e6   :  { %v506_v11 = vsub.f32 %v498_v48, %v504_v10  ;;  %v502_v12 = vpop.xlane.xlu1 %501 }
 0x3e7   :  { %v505_v13 = vsub.f32 %v493_v50, %v502_v12 }
 0x3e8   :  { %v509_v14 = vmul.f32 1.442695, %v506_v11 }
 0x3e9   :  { %v507_v15 = vmul.f32 1.442695, %v505_v13 }
 0x3eb   :  { %1371 = vpow2.f32 %v507_v15 }
 0x3ec   :  { %1373 = vpow2.f32 %v509_v14 }
 0x3f5   :  { %v1372_v16 = vpop.eup %1371 }
 0x3f6   :  { %v1374_v17 = vpop.eup %1373  ;;  %1205 = vmatprep.mubr.f32.mxu1 %v1372_v16  ;;  %1240 = vmatprep.mubr.f32.mxu0 %v1372_v16 }
 0x3f7   :  { %1206 = vmatmul.mubr.f32.vlgmr.msra.gmra.mrb[4].mxu1 %v1374_v17  ;;  %1241 = vmatmul.mubr.f32.vlgmr.msra.gmra.mrb[22].mxu0 %v1374_v17 }
 0x3f8   :  { %1353 = vmatpush3.bf16.msra.mxu1 %v1350_v20 }
 0x3f9   :  { %1355 = vmatprep.subr.bf16.mxu1 %v1354_v23 }
 0x3fc   :  { %1357 = vmatpush3.bf16.msra.mxu1 %v1354_v23 }
 0x4ca   :  { %v1207_v24 = vpop.f32.mrb[4].mxu1  ;;  %v1242_v25 = vpop.f32.mrb[22].mxu0 }
 0x4cb   :  { %1375 = vrcp.f32 %v1242_v25  ;;  %v794_v26 = vpop.f32.mrb[5].mxu1  ;;  %v869_v27 = vpop.f32.mrb[23].mxu0 }
 0x4cc   :  { %1377 = vrcp.f32 %v869_v27 }
 0x4d5   :  { %v1376_v28 = vpop.eup %1375 }
 0x4d6   :  { %v1378_v29 = vpop.eup %1377  ;;  %v881_v30 = vmul.f32 %v1376_v28, %v1207_v24 }
 0x4d7   :  { %v880_v31 = vmul.f32 %v1378_v29, %v794_v26 }
 0x4d9   :  { %1251 = vmatprep.mubr.msk.f32.mxu1 %vm119_vm0, %v880_v31 }
 0x4da   :  { %1252 = vmatmul.mubr.msk.f32.vlgmr.msra.gmra.mrb[6].mxu1 %vm119_vm0, %v881_v30 }
 0x5ad   :  { %v1253_v33 = vpop.f32.mrb[6].mxu1 }
 0x5ae   :  { %v964_v34 = vadd.f32 %v1253_v33, %v1015_v32  ;;  %v958_v35 = vpop.f32.mrb[7].mxu1 }
 0x5af   :  { %v959_v36 = vadd.f32 %v1015_v32, %v958_v35 }
 0x5b0   :  { %968 = vst.msk [vmem:[#allocation8 + $0x8] sm:$0xff] %vm119_vm0, %v964_v34 }
 0x5b1   :  { %967 = vst.msk [vmem:[#allocation8] sm:$0xff] %vm119_vm0, %v959_v36 }
 0x5b2   :  { %1456 = shalt.err (!%p1453_p0)
}
 0x5b3   :  { %s1457_s28 = scalar_lea.hbm %s1600_s3, 256 }
 0x5b4   :  { %p1458_p1 = scmp.ne.s32.totalorder %s1600_s3, %s1457_s28  ;;  %p1461_p2 = scmp.lt.u32.totalorder %s1457_s28, %s1600_s3 }
 0x5b6   :  { %p1463_p3 = pnand %p1461_p2, %p1458_p1 }
 0x5b8   :  { %1466 = shalt.err (!%p1463_p3)
}
 0x5b9   :  { %980 = dma.vmem_to_hbm [thread:$0]  %s975_s22, 256, %s1600_s3, [#allocation4], %s1475_s24, %s1475_s24, %s1476_s25  }
 0x5ba   :  { %1471 = dma.done.wait [#allocation4], 256  }
 0x5bb   :  { %1472 = vsyncadd [#allocation4], 4294967040 }
 0x5bc   :  { %984 = vsyncpa [#allocation3], 1 }
 0x5bd   :  { %985 = vsyncpa [#allocation6], 1 }
 0x5be   :  { %986 = vsyncpa [#allocation4], 1 }

</bundles_post_ra>
